<compile_context>
chip_gen: v6e
topology: v6e:2x2x1
jax: 0.10.0
libtpu: 0.0.40
codegen_flags: <defaults>
</compile_context>

<pallas_src>
import functools

import jax
import jax.numpy as jnp
import numpy as np
from jax import lax
from jax.experimental import pallas as pl
from jax.experimental.pallas import tpu as pltpu


def variable_net_kernel(meta_ref, coord_ref, cdata_ref,
                        wpre_ref, wf1w_ref, wf1b_ref, bf1w_ref,
                        wr1_ref, wr2_ref, vecs_ref,
                        out_ref, *, B, C, N, H):
    # Packed row vectors / scalars (one small DMA).
    b_pre    = vecs_ref[0:1, :]        # (1, H)
    b_r1     = vecs_ref[1:2, :]        # (1, H)
    b_r2     = vecs_ref[2:3, :]        # (1, H)
    pe_freq  = vecs_ref[3:4, :]        # (1, H)
    pe_phase = vecs_ref[4:5, :]        # (1, H)
    wout_row = vecs_ref[5:6, :]        # (1, H)  out_fc weight as a row
    bf1_b    = vecs_ref[6:7, 0:1]      # (1, 1)  feat_fc1 bias[last]
    b_out    = vecs_ref[6:7, 1:2]      # (1, 1)  out_fc bias

    # feat_fc_pre with the batch folded into the row (M) dim: (B*C, T) @ (T, H).
    feat1 = jnp.dot(meta_ref[...], wpre_ref[...],
                    preferred_element_type=jnp.float32) + b_pre          # (B*C, H)

    coord = coord_ref[...]             # (B*N, C)
    wf1w = wf1w_ref[...]               # (H, C) = W_f1[:H]
    wf1b = wf1b_ref[...]               # (1, C) = W_f1[H]
    bf1w = bf1w_ref[...]               # (H, 1) = b_f1[:H]

    # Per-batch bmm's: B is tiny and static -> statically unrolled inside one invocation.
    zs = []
    for b in range(B):
        feat1_b = feat1[b * C:(b + 1) * C, :]                            # (C, H)
        coord_b = coord[b * N:(b + 1) * N, :]                            # (N, C)
        # x = bmm(coord, feat1)
        x_b = jnp.dot(coord_b, feat1_b,
                      preferred_element_type=jnp.float32)                # (N, H)
        # w1^T and b1 built directly from the split feat_fc1 params
        # (no (H+1, H) intermediate, no tile-crossing slices).
        w1t_b = jnp.dot(wf1w, feat1_b,
                        preferred_element_type=jnp.float32) + bf1w       # (H, H) = w1^T
        b1_b = jnp.dot(wf1b, feat1_b,
                       preferred_element_type=jnp.float32) + bf1_b       # (1, H)
        # x @ w1  (contract x dim 1 with w1^T dim 1)
        z_b = lax.dot_general(x_b, w1t_b, (((1,), (1,)), ((), ())),
                              preferred_element_type=jnp.float32) + b1_b
        zs.append(jnp.maximum(z_b, 0.0))
    z = jnp.concatenate(zs, axis=0)                                      # (B*N, H)

    # SineCosPE stays in-kernel (EUP slot overlaps with MXU/VPU work).
    pe = jnp.sin(cdata_ref[...] * pe_freq + pe_phase)                    # (B*N, H)
    cat_x = z + pe

    # ResMLP + residuals with the batch folded into rows.
    h1 = jnp.maximum(
        jnp.dot(cat_x, wr1_ref[...], preferred_element_type=jnp.float32) + b_r1, 0.0)
    r = jnp.dot(h1, wr2_ref[...], preferred_element_type=jnp.float32) + b_r2
    y = r + 2.0 * cat_x                                                  # (B*N, H)

    # out_fc (H -> 1) for the whole folded batch at once, written as a
    # lane-dense (1, B*N) row.
    out_row = lax.dot_general(wout_row, y, (((1,), (1,)), ((), ())),
                              preferred_element_type=jnp.float32) + b_out
    out_ref[...] = out_row


def build_params(key, token_num, in_channels, hidden):
    ks = jax.random.split(key, 10)
    s = 0.1
    p = {
        'w_pre': s * jax.random.normal(ks[0], (token_num, hidden), jnp.float32),
        'b_pre': s * jax.random.normal(ks[1], (1, hidden), jnp.float32),
        'w_f1':  s * jax.random.normal(ks[2], (hidden + 1, in_channels), jnp.float32),
        'b_f1':  s * jax.random.normal(ks[3], (hidden + 1, 1), jnp.float32),
        'w_r1':  s * jax.random.normal(ks[4], (hidden, hidden), jnp.float32),
        'b_r1':  s * jax.random.normal(ks[5], (1, hidden), jnp.float32),
        'w_r2':  s * jax.random.normal(ks[6], (hidden, hidden), jnp.float32),
        'b_r2':  s * jax.random.normal(ks[7], (1, hidden), jnp.float32),
        'w_out': s * jax.random.normal(ks[8], (hidden, 1), jnp.float32),
        'b_out': s * jax.random.normal(ks[9], (1, 1), jnp.float32),
    }
    n_freqs = hidden // 2
    freqs = 2.0 ** jnp.arange(n_freqs, dtype=jnp.float32)
    p['pe_freq'] = jnp.repeat(freqs, 2).reshape(1, hidden)                   # f0,f0,f1,f1,...
    p['pe_phase'] = jnp.tile(jnp.array([0.0, np.pi / 2], jnp.float32),
                             n_freqs).reshape(1, hidden)                     # sin,cos,sin,cos,...
    return p


def variable_net_forward(meta4d, coord, coord_data, p):
    B, C, Hs, Ws = meta4d.shape
    T = Hs * Ws
    N = coord.shape[1]
    H = p['w_pre'].shape[1]

    # Fold the batch into the row dimension (free layout plumbing in the wrapper).
    meta_flat = meta4d.reshape(B * C, T)
    coord_flat = coord.reshape(B * N, C)
    cdata_flat = coord_data.reshape(B * N, 1)

    # Split feat_fc1 at the source (no (H+1, H) slicing inside the kernel).
    wf1w = p['w_f1'][:H, :]              # (H, C)
    wf1b_row = p['w_f1'][H:H + 1, :]     # (1, C)
    bf1w_col = p['b_f1'][:H, :]          # (H, 1)

    # Pack all (1, H) rows + scalars into one (8, H) array -> single DMA.
    scalars = jnp.zeros((1, H), jnp.float32)
    scalars = scalars.at[0, 0].set(p['b_f1'][H, 0])   # feat_fc1 bias[last]
    scalars = scalars.at[0, 1].set(p['b_out'][0, 0])  # out_fc bias
    vecs = jnp.concatenate([
        p['b_pre'],                       # row 0
        p['b_r1'],                        # row 1
        p['b_r2'],                        # row 2
        p['pe_freq'],                     # row 3
        p['pe_phase'],                    # row 4
        p['w_out'].reshape(1, H),         # row 5: out_fc weight as a row
        scalars,                          # row 6: [b_f1[H], b_out, 0, ...]
        jnp.zeros((1, H), jnp.float32),   # row 7: pad to a full sublane tile
    ], axis=0)

    kernel = functools.partial(variable_net_kernel, B=B, C=C, N=N, H=H)
    vmem = pl.BlockSpec(memory_space=pltpu.MemorySpace.VMEM)
    out_row = pl.pallas_call(
        kernel,
        out_shape=jax.ShapeDtypeStruct((1, B * N), jnp.float32),
        in_specs=[vmem] * 10,
        out_specs=vmem,
    )(meta_flat, coord_flat, cdata_flat,
      p['w_pre'], wf1w, wf1b_row, bf1w_col, p['w_r1'], p['w_r2'], vecs)

    # Restore the module's (B, N, 1) output shape (free wrapper-side reshape).
    return out_row.reshape(B, N, 1)


def ref_forward(meta4d, coord, coord_data, p):
    B, C = meta4d.shape[:2]
    H = p['w_pre'].shape[1]
    meta = meta4d.reshape(B, C, -1)
    feat1 = meta @ p['w_pre'] + p['b_pre']                             # (B,C,H)
    x = jnp.einsum('bnc,bch->bnh', coord, feat1)                       # (B,N,H)
    feat2 = jnp.einsum('bch,kc->bhk', feat1, p['w_f1']) + p['b_f1'][:, 0]
    w1 = feat2[:, :, :H]
    b1 = feat2[:, :, H][:, None, :]
    x = jnp.maximum(jnp.einsum('bnh,bhk->bnk', x, w1) + b1, 0.0)
    cdata = coord_data.reshape(B, -1, 1)
    pe = jnp.sin(cdata * p['pe_freq'] + p['pe_phase'])
    cat_x = x + pe
    h1 = jnp.maximum(cat_x @ p['w_r1'] + p['b_r1'], 0.0)
    r = h1 @ p['w_r2'] + p['b_r2']
    y = r + 2.0 * cat_x
    return y @ p['w_out'] + p['b_out']


if __name__ == "__main__":
    B, C, Hs, Ws = 2, 4, 4, 4          # in_channels = 4, token_num = 16
    token_num = Hs * Ws
    hidden = 32
    N = 8                              # number of query coords

    key = jax.random.PRNGKey(0)
    k1, k2, k3, kp = jax.random.split(key, 4)
    meta4d = jax.random.normal(k1, (B, C, Hs, Ws), jnp.float32)
    coord = jax.random.normal(k2, (B, N, C), jnp.float32)
    coord_data = 0.1 * jax.random.normal(k3, (B, N), jnp.float32)

    params = build_params(kp, token_num, C, hidden)

    out = variable_net_forward(meta4d, coord, coord_data, params)
    out = jax.block_until_ready(out)

    ref = ref_forward(meta4d, coord, coord_data, params)
    np.testing.assert_allclose(np.asarray(out), np.asarray(ref), rtol=3e-2, atol=3e-2)
    assert out.shape == (B, N, 1)
    print("KERNEL_OK")
</pallas_src>

<mosaic_0001>
module attributes {stable_mosaic.version = 11 : i64} {
  func.func @variable_net_kernel(%arg0: memref<8x16xf32, #tpu.memory_space<vmem>>, %arg1: memref<16x4xf32, #tpu.memory_space<vmem>>, %arg2: memref<16x1xf32, #tpu.memory_space<vmem>>, %arg3: memref<16x32xf32, #tpu.memory_space<vmem>>, %arg4: memref<32x4xf32, #tpu.memory_space<vmem>>, %arg5: memref<1x4xf32, #tpu.memory_space<vmem>>, %arg6: memref<32x1xf32, #tpu.memory_space<vmem>>, %arg7: memref<32x32xf32, #tpu.memory_space<vmem>>, %arg8: memref<32x32xf32, #tpu.memory_space<vmem>>, %arg9: memref<8x32xf32, #tpu.memory_space<vmem>>, %arg10: memref<1x16xf32, #tpu.memory_space<vmem>>) attributes {dimension_semantics = [], scalar_prefetch = 0 : i64, scratch_operands = 0 : i64, tpu.core_type = #tpu.core_type<tc>} {
    %c0 = arith.constant 0 : index
    %c0_0 = arith.constant 0 : index
    %0 = vector.load %arg9[%c0, %c0_0] : memref<8x32xf32, #tpu.memory_space<vmem>>, vector<1x32xf32>
    %c1 = arith.constant 1 : index
    %c0_1 = arith.constant 0 : index
    %1 = vector.load %arg9[%c1, %c0_1] : memref<8x32xf32, #tpu.memory_space<vmem>>, vector<1x32xf32>
    %c2 = arith.constant 2 : index
    %c0_2 = arith.constant 0 : index
    %2 = vector.load %arg9[%c2, %c0_2] : memref<8x32xf32, #tpu.memory_space<vmem>>, vector<1x32xf32>
    %c3 = arith.constant 3 : index
    %c0_3 = arith.constant 0 : index
    %3 = vector.load %arg9[%c3, %c0_3] : memref<8x32xf32, #tpu.memory_space<vmem>>, vector<1x32xf32>
    %c4 = arith.constant 4 : index
    %c0_4 = arith.constant 0 : index
    %4 = vector.load %arg9[%c4, %c0_4] : memref<8x32xf32, #tpu.memory_space<vmem>>, vector<1x32xf32>
    %c5 = arith.constant 5 : index
    %c0_5 = arith.constant 0 : index
    %5 = vector.load %arg9[%c5, %c0_5] : memref<8x32xf32, #tpu.memory_space<vmem>>, vector<1x32xf32>
    %c6 = arith.constant 6 : index
    %c0_6 = arith.constant 0 : index
    %6 = vector.load %arg9[%c6, %c0_6] : memref<8x32xf32, #tpu.memory_space<vmem>>, vector<1x1xf32>
    %c6_7 = arith.constant 6 : index
    %c1_8 = arith.constant 1 : index
    %7 = vector.load %arg9[%c6_7, %c1_8] : memref<8x32xf32, #tpu.memory_space<vmem>>, vector<1x1xf32>
    %c0_9 = arith.constant 0 : index
    %c0_10 = arith.constant 0 : index
    %8 = vector.load %arg0[%c0_9, %c0_10] : memref<8x16xf32, #tpu.memory_space<vmem>>, vector<8x16xf32>
    %c0_11 = arith.constant 0 : index
    %c0_12 = arith.constant 0 : index
    %9 = vector.load %arg3[%c0_11, %c0_12] : memref<16x32xf32, #tpu.memory_space<vmem>>, vector<16x32xf32>
    %cst = arith.constant dense<0.000000e+00> : vector<8x32xf32>
    %10 = tpu.matmul %8, %9, %cst {dimension_numbers = #tpu.dot_dimension_numbers<[1], [0], [0], [1], [0, 0, 1, 1], [], []>} : vector<8x16xf32>, vector<16x32xf32>, vector<8x32xf32> -> vector<8x32xf32>
    %11 = vector.broadcast %0 : vector<1x32xf32> to vector<8x32xf32>
    %12 = arith.addf %10, %11 : vector<8x32xf32>
    %c0_13 = arith.constant 0 : index
    %c0_14 = arith.constant 0 : index
    %13 = vector.load %arg1[%c0_13, %c0_14] : memref<16x4xf32, #tpu.memory_space<vmem>>, vector<16x4xf32>
    %c0_15 = arith.constant 0 : index
    %c0_16 = arith.constant 0 : index
    %14 = vector.load %arg4[%c0_15, %c0_16] : memref<32x4xf32, #tpu.memory_space<vmem>>, vector<32x4xf32>
    %c0_17 = arith.constant 0 : index
    %c0_18 = arith.constant 0 : index
    %15 = vector.load %arg5[%c0_17, %c0_18] : memref<1x4xf32, #tpu.memory_space<vmem>>, vector<1x4xf32>
    %c0_19 = arith.constant 0 : index
    %c0_20 = arith.constant 0 : index
    %16 = vector.load %arg6[%c0_19, %c0_20] : memref<32x1xf32, #tpu.memory_space<vmem>>, vector<32x1xf32>
    %17 = vector.extract_strided_slice %12 {offsets = [0, 0], sizes = [4, 32], strides = [1, 1]} : vector<8x32xf32> to vector<4x32xf32>
    %18 = vector.extract_strided_slice %13 {offsets = [0, 0], sizes = [8, 4], strides = [1, 1]} : vector<16x4xf32> to vector<8x4xf32>
    %cst_21 = arith.constant dense<0.000000e+00> : vector<8x32xf32>
    %19 = tpu.matmul %18, %17, %cst_21 {dimension_numbers = #tpu.dot_dimension_numbers<[1], [0], [0], [1], [0, 0, 1, 1], [], []>} : vector<8x4xf32>, vector<4x32xf32>, vector<8x32xf32> -> vector<8x32xf32>
    %cst_22 = arith.constant dense<0.000000e+00> : vector<32x32xf32>
    %20 = tpu.matmul %14, %17, %cst_22 {dimension_numbers = #tpu.dot_dimension_numbers<[1], [0], [0], [1], [0, 0, 1, 1], [], []>} : vector<32x4xf32>, vector<4x32xf32>, vector<32x32xf32> -> vector<32x32xf32>
    %21 = vector.broadcast %16 : vector<32x1xf32> to vector<32x32xf32>
    %22 = arith.addf %20, %21 : vector<32x32xf32>
    %cst_23 = arith.constant dense<0.000000e+00> : vector<1x32xf32>
    %23 = tpu.matmul %15, %17, %cst_23 {dimension_numbers = #tpu.dot_dimension_numbers<[1], [0], [0], [1], [0, 0, 1, 1], [], []>} : vector<1x4xf32>, vector<4x32xf32>, vector<1x32xf32> -> vector<1x32xf32>
    %24 = vector.broadcast %6 : vector<1x1xf32> to vector<1x32xf32>
    %25 = arith.addf %23, %24 : vector<1x32xf32>
    %cst_24 = arith.constant dense<0.000000e+00> : vector<8x32xf32>
    %26 = tpu.matmul %19, %22, %cst_24 {dimension_numbers = #tpu.dot_dimension_numbers<[1], [1], [0], [0], [0, 0, 1, 0], [], []>} : vector<8x32xf32>, vector<32x32xf32>, vector<8x32xf32> -> vector<8x32xf32>
    %27 = vector.broadcast %25 : vector<1x32xf32> to vector<8x32xf32>
    %28 = arith.addf %26, %27 : vector<8x32xf32>
    %cst_25 = arith.constant 0.000000e+00 : f32
    %29 = vector.broadcast %cst_25 : f32 to vector<8x32xf32>
    %30 = arith.maximumf %28, %29 : vector<8x32xf32>
    %31 = vector.extract_strided_slice %12 {offsets = [4, 0], sizes = [4, 32], strides = [1, 1]} : vector<8x32xf32> to vector<4x32xf32>
    %32 = vector.extract_strided_slice %13 {offsets = [8, 0], sizes = [8, 4], strides = [1, 1]} : vector<16x4xf32> to vector<8x4xf32>
    %cst_26 = arith.constant dense<0.000000e+00> : vector<8x32xf32>
    %33 = tpu.matmul %32, %31, %cst_26 {dimension_numbers = #tpu.dot_dimension_numbers<[1], [0], [0], [1], [0, 0, 1, 1], [], []>} : vector<8x4xf32>, vector<4x32xf32>, vector<8x32xf32> -> vector<8x32xf32>
    %cst_27 = arith.constant dense<0.000000e+00> : vector<32x32xf32>
    %34 = tpu.matmul %14, %31, %cst_27 {dimension_numbers = #tpu.dot_dimension_numbers<[1], [0], [0], [1], [0, 0, 1, 1], [], []>} : vector<32x4xf32>, vector<4x32xf32>, vector<32x32xf32> -> vector<32x32xf32>
    %35 = vector.broadcast %16 : vector<32x1xf32> to vector<32x32xf32>
    %36 = arith.addf %34, %35 : vector<32x32xf32>
    %cst_28 = arith.constant dense<0.000000e+00> : vector<1x32xf32>
    %37 = tpu.matmul %15, %31, %cst_28 {dimension_numbers = #tpu.dot_dimension_numbers<[1], [0], [0], [1], [0, 0, 1, 1], [], []>} : vector<1x4xf32>, vector<4x32xf32>, vector<1x32xf32> -> vector<1x32xf32>
    %38 = vector.broadcast %6 : vector<1x1xf32> to vector<1x32xf32>
    %39 = arith.addf %37, %38 : vector<1x32xf32>
    %cst_29 = arith.constant dense<0.000000e+00> : vector<8x32xf32>
    %40 = tpu.matmul %33, %36, %cst_29 {dimension_numbers = #tpu.dot_dimension_numbers<[1], [1], [0], [0], [0, 0, 1, 0], [], []>} : vector<8x32xf32>, vector<32x32xf32>, vector<8x32xf32> -> vector<8x32xf32>
    %41 = vector.broadcast %39 : vector<1x32xf32> to vector<8x32xf32>
    %42 = arith.addf %40, %41 : vector<8x32xf32>
    %cst_30 = arith.constant 0.000000e+00 : f32
    %43 = vector.broadcast %cst_30 : f32 to vector<8x32xf32>
    %44 = arith.maximumf %42, %43 : vector<8x32xf32>
    %45 = tpu.concatenate %30, %44 in 0 : vector<8x32xf32>, vector<8x32xf32> -> vector<16x32xf32>
    %c0_31 = arith.constant 0 : index
    %c0_32 = arith.constant 0 : index
    %46 = vector.load %arg2[%c0_31, %c0_32] : memref<16x1xf32, #tpu.memory_space<vmem>>, vector<16x1xf32>
    %47 = vector.broadcast %46 : vector<16x1xf32> to vector<16x32xf32>
    %48 = vector.broadcast %3 : vector<1x32xf32> to vector<16x32xf32>
    %49 = arith.mulf %47, %48 : vector<16x32xf32>
    %50 = vector.broadcast %4 : vector<1x32xf32> to vector<16x32xf32>
    %51 = arith.addf %49, %50 : vector<16x32xf32>
    %52 = math.sin %51 : vector<16x32xf32>
    %53 = arith.addf %45, %52 : vector<16x32xf32>
    %c0_33 = arith.constant 0 : index
    %c0_34 = arith.constant 0 : index
    %54 = vector.load %arg7[%c0_33, %c0_34] : memref<32x32xf32, #tpu.memory_space<vmem>>, vector<32x32xf32>
    %cst_35 = arith.constant dense<0.000000e+00> : vector<16x32xf32>
    %55 = tpu.matmul %53, %54, %cst_35 {dimension_numbers = #tpu.dot_dimension_numbers<[1], [0], [0], [1], [0, 0, 1, 1], [], []>} : vector<16x32xf32>, vector<32x32xf32>, vector<16x32xf32> -> vector<16x32xf32>
    %56 = vector.broadcast %1 : vector<1x32xf32> to vector<16x32xf32>
    %57 = arith.addf %55, %56 : vector<16x32xf32>
    %cst_36 = arith.constant 0.000000e+00 : f32
    %58 = vector.broadcast %cst_36 : f32 to vector<16x32xf32>
    %59 = arith.maximumf %57, %58 : vector<16x32xf32>
    %c0_37 = arith.constant 0 : index
    %c0_38 = arith.constant 0 : index
    %60 = vector.load %arg8[%c0_37, %c0_38] : memref<32x32xf32, #tpu.memory_space<vmem>>, vector<32x32xf32>
    %cst_39 = arith.constant dense<0.000000e+00> : vector<16x32xf32>
    %61 = tpu.matmul %59, %60, %cst_39 {dimension_numbers = #tpu.dot_dimension_numbers<[1], [0], [0], [1], [0, 0, 1, 1], [], []>} : vector<16x32xf32>, vector<32x32xf32>, vector<16x32xf32> -> vector<16x32xf32>
    %62 = vector.broadcast %2 : vector<1x32xf32> to vector<16x32xf32>
    %63 = arith.addf %61, %62 : vector<16x32xf32>
    %cst_40 = arith.constant 2.000000e+00 : f32
    %64 = vector.broadcast %cst_40 : f32 to vector<16x32xf32>
    %65 = arith.mulf %64, %53 : vector<16x32xf32>
    %66 = arith.addf %63, %65 : vector<16x32xf32>
    %cst_41 = arith.constant dense<0.000000e+00> : vector<1x16xf32>
    %67 = tpu.matmul %5, %66, %cst_41 {dimension_numbers = #tpu.dot_dimension_numbers<[1], [1], [0], [0], [0, 0, 1, 0], [], []>} : vector<1x32xf32>, vector<16x32xf32>, vector<1x16xf32> -> vector<1x16xf32>
    %68 = vector.broadcast %7 : vector<1x1xf32> to vector<1x16xf32>
    %69 = arith.addf %67, %68 : vector<1x16xf32>
    %c0_42 = arith.constant 0 : index
    %c0_43 = arith.constant 0 : index
    %70 = vector.load %arg10[%c0_42, %c0_43] : memref<1x16xf32, #tpu.memory_space<vmem>>, vector<1x16xf32>
    tpu.vector_store %arg10[%c0_42, %c0_43], %69 {strides = array<i32>} : memref<1x16xf32, #tpu.memory_space<vmem>>, vector<1x16xf32>,
    return
  }
}

</mosaic_0001>

<bundles_post_ra>
// kernel: tpu_custom_call.1
= control target key start
LH: loop header
LB: loop body
LE: loop exit
PB: predicated region body
PF: predicated region fallthrough
CT: control target
= control target key end

     0   :  { %v1579_v1 = vmov 0.0   ;;  %vm1580_vm0 = vmmov 0   ;;  %vm50_vm1 = vcmask 130048   ;;  %v1581_v5 = vmov 0   ;;  %s1928_s0 = inlined_call_operand.vmem [shape: f32[8,16], index: 0, kind: input, shape index: {}]   ;;  %s1929_s1 = inlined_call_operand.vmem [shape: f32[16,4], index: 1, kind: input, shape index: {}]   ;;  %s1930_s2 = inlined_call_operand.vmem [shape: f32[16,1], index: 2, kind: input, shape index: {}]   ;;  %s1931_s3 = inlined_call_operand.vmem [shape: f32[16,32], index: 3, kind: input, shape index: {}]   ;;  %s1932_s4 = inlined_call_operand.vmem [shape: f32[32,4], index: 4, kind: input, shape index: {}]   ;;  %s1933_s5 = inlined_call_operand.vmem [shape: f32[1,4], index: 5, kind: input, shape index: {}]   ;;  %s1934_s6 = inlined_call_operand.vmem [shape: f32[32,1], index: 6, kind: input, shape index: {}]   ;;  %s1935_s7 = inlined_call_operand.vmem [shape: f32[32,32], index: 7, kind: input, shape index: {}]   ;;  %s1936_s8 = inlined_call_operand.vmem [shape: f32[32,32], index: 8, kind: input, shape index: {}]   ;;  %s1937_s9 = inlined_call_operand.vmem [shape: f32[8,32], index: 9, kind: input, shape index: {}]   ;;  %s1938_s10 = inlined_call_operand.hbm [shape: f32[1,16], index: 10, kind: output, shape index: {}]  }
   0x1   :  { %v45_v0 = vld [vmem:[%s1931_s3 + $0x8] sm:$0xff]  ;;  %1432 = vmatprep.subr.mxu0 %v1579_v1  ;;  %v44_v2 = vld [vmem:[%s1931_s3] sm:$0xff]  ;;  %1436 = vmatprep.mubr.msk.f32.mxu0 %vm1580_vm0, %v1579_v1  ;;  %v134_v3 = vld [vmem:[%s1934_s6 + $0x18] sm:$0xff] }
   0x2   :  { %1433 = vmatpush3.msra.mxu0 %v45_v0  ;;  %v43_v4 = vld [vmem:[%s1928_s0] sm:$0xff]  ;;  %1545 = vset.pattern.permute.xlu0 %v1581_v5  ;;  %v132_v6 = vld [vmem:[%s1934_s6 + $0x8] sm:$0xff] }
   0x3   :  { %15 = vsyncpa [#allocation3], 0  ;;  %1434 = vmatprep.subr.mxu0 %v1579_v1  ;;  %230 = vperm.xlu0 %1545, %v134_v3   ;;  %v133_v7 = vld [vmem:[%s1934_s6 + $0x10] sm:$0xff]  ;;  %v820_v8 = vld [vmem:[%s1930_s2] sm:$0xff]  ;;  %vm135_vm2 = vcmask 31744   ;;  %vm139_vm3 = vcmask 1043456  }
   0x4   :  { %1435 = vmatpush3.msra.mxu0 %v44_v2  ;;  %1546 = vset.pattern.permute.xlu1 %v1581_v5  ;;  %v131_v9 = vld [vmem:[%s1934_s6] sm:$0xff]  ;;  %v821_v11 = vld [vmem:[%s1930_s2 + $0x8] sm:$0xff]  ;;  %v128_v19 = vld [vmem:[%s1932_s4 + $0x10] sm:$0xff]  ;;  %vm412_vm4 = vcmask 261120   ;;  %s1589_s22 = smov [#allocation2]  }
   0x5   :  { %1437 = vmatmul.mubr.msk.f32.vlgmr.msra.gmra.mxu0 %vm50_vm1, %v43_v4  ;;  %220 = vperm.xlu1 %1546, %v132_v6   ;;  %v126_v10 = vld [vmem:[%s1932_s4] sm:$0xff]  ;;  %v127_v18 = vld [vmem:[%s1932_s4 + $0x8] sm:$0xff]  ;;  %v129_v21 = vld [vmem:[%s1932_s4 + $0x18] sm:$0xff] }
   0x6   :  { %1439 = vmatprep.subr.mxu0 %v1579_v1  ;;  %1441 = vmatprep.mubr.msk.f32.mxu0 %vm1580_vm0, %v1579_v1  ;;  %v1686_v12 = vld [vmem:[%s1937_s9 + $0x6] sm:$0x1]  ;;  %v1337_v13 = vld [vmem:[%s1937_s9] ss:$0 sm:$0xff]  ;;  %v125_v23 = vld [vmem:[%s1929_s1 + $0x8] sm:$0xff] }
   0x7   :  { %225 = vperm.xlu0 %1545, %v133_v7   ;;  %1446 = vmatprep.mubr.msk.f32.mxu1 %vm135_vm2, %v126_v10  ;;  %v124_v16 = vld [vmem:[%s1929_s1] sm:$0xff] }
   0x8   :  { %v130_v20 = vld [vmem:[%s1933_s5] sm:$0x1]  ;;  %v1367_v53 = vld [vmem:[%s1937_s9 + $0x3] ss:$0 sm:$0xff]  ;;  %v1368_v55 = vld [vmem:[%s1937_s9 + $0x4] ss:$0 sm:$0xff] }
   0x9   :  { %215 = vperm.xlu1 %1546, %v131_v9   ;;  %s1329_s5 = sshll.u32 %s1589_s22, 4  ;;  %s1330_s5 = int_to_ptr.vmem [resolvable:$true] %s1329_s5 }
   0xa   :  { %s1557_s3 = scalar_lea.vmem %s1330_s5, 16  ;;  %s1561_s1 = scalar_lea.vmem %s1330_s5, 32 }
   0xb   :  { %824 = vperm.xlu0 %1545, %v820_v8   ;;  %v1582_v8 = vmov 2102212464   ;;  %p1558_p0 = scmp.ne.s32.totalorder %s1330_s5, %s1557_s3  ;;  %p1562_p1 = scmp.lt.s32.totalorder %s1330_s5, %s1330_s5 }
   0xc   :  { %p1563_p2 = scmp.lt.s32.totalorder %s1561_s1, %s1557_s3 }
   0xd   :  { %829 = vperm.xlu1 %1546, %v821_v11  }
   0xe   :  { %p1564_p3 = por %p1563_p2, %p1562_p1 }
   0xf   :  { %332 = vperm.xlu0 %1545, %v1686_v12  }
  0x10   :  { %p1565_p4 = pnand %p1564_p3, %p1558_p0 }
  0x7e   :  { %v231_v27 = vpop.permute.xlu0 %230 }
  0x80   :  { %v221_v38 = vpop.permute.xlu1 %220 }
  0x82   :  { %v226_v35 = vpop.permute.xlu0 %225 }
  0x84   :  { %v216_v43 = vpop.permute.xlu1 %215 }
  0x86   :  { %v825_v52 = vpop.permute.xlu0 %824 }
  0x87   :  { %v836_v54 = vmul.f32 %v1367_v53, %v825_v52 }
  0x88   :  { %v830_v59 = vpop.permute.xlu1 %829 }
  0x89   :  { %v1773_v56 = vadd.f32 %v1368_v55, %v836_v54  ;;  %v837_v61 = vmul.f32 %v1367_v53, %v830_v59 }
  0x8b   :  { %v847_v57 = vand.u32 2139095040, %v1773_v56  ;;  %v1776_v63 = vadd.f32 %v1368_v55, %v837_v61 }
  0x8d   :  { %v848_v58 = vshrl.u32 %v847_v57, 23  ;;  %v951_v0 = vand.u32 2139095040, %v1776_v63  ;;  %v948_v55 = vand.u32 2147483647, %v1776_v63 }
  0x8f   :  { %v1369_v60 = vadd.s32 4294967169, %v848_v58  ;;  %v952_v3 = vshrl.u32 %v951_v0, 23 }
  0x91   :  { %v854_v62 = vadd.s32 1, %v1369_v60  ;;  %v1373_v5 = vadd.s32 4294967169, %v952_v3 }
  0x93   :  { %vm855_vm5 = vcmp.gt.s32.totalorder %v854_v62, 0  ;;  %v958_v7 = vadd.s32 1, %v1373_v5 }
  0x94   :  { %v856_v2 = vsel %vm855_vm5, %v854_v62, 0 }
  0x95   :  { %v858_v4 = vand.u32 31, %v856_v2  ;;  %vm959_vm6 = vcmp.gt.s32.totalorder %v958_v7, 0 }
  0x97   :  { %v859_v6 = vsub.s32 32, %v858_v4  ;;  %v870_v9 = vshll.u32 %v1582_v8, %v858_v4 }
  0xc5   :  { %v120_v14 = vpop.f32.mrf.mxu0 }
  0xc6   :  { %v121_v15 = vadd.f32 %v1337_v13, %v120_v14  ;;  %v844_v13 = vand.u32 2147483647, %v1773_v56  ;;  %v1780_v14 = vshrl.u32 %v856_v2, 5 }
  0xc7   :  { %v1438_v17 = vpop.f32.mrf.mxu0 }
  0xc8   :  { %1440 = vmatpush3.msk.msra.mxu0 %vm139_vm3, %v121_v15  ;;  %1444 = vmatprep.subr.msk.mxu1 %vm139_vm3, %v121_v15  ;;  %v499_v22 = vrot.slane %v121_v15, 4  ;;  %v1585_v17 = vmov 2475754826   ;;  %vm879_vm7 = vcmp.lt.s32.totalorder %v1780_v14, 4  ;;  %vm876_vm8 = vcmp.lt.s32.totalorder %v1780_v14, 1 }
  0xc9   :  { %1442 = vmatmul.mubr.msk.f32.vlgmr.msra.gmra.mxu0 %vm135_vm2, %v124_v16  ;;  %1445 = vmatpush3.msk.msra.mxu1 %vm139_vm3, %v121_v15  ;;  %vm878_vm9 = vcmp.lt.s32.totalorder %v1780_v14, 3  ;;  %vm877_vm10 = vcmp.lt.s32.totalorder %v1780_v14, 2  ;;  %vm845_vm5 = vcmp.le.f32.partialorder %v844_v13, 0.7853982 }
  0xca   :  { %1452 = vmatprep.subr.mxu0 %v1579_v1  ;;  %1447 = vmatmul.mubr.msk.f32.vlgmr.msra.gmra.mxu1 %vm135_vm2, %v127_v18 }
  0xcb   :  { %1453 = vmatpush3.msk.msra.mxu0 %vm139_vm3, %v121_v15  ;;  %1454 = vmatprep.mubr.msk.f32.mxu0 %vm1580_vm0, %v1579_v1  ;;  %v1584_v15 = vmov 683565275  }
  0xcc   :  { %1468 = vmatprep.subr.mxu0 %v1579_v1  ;;  %1449 = vmatprep.mubr.msk.f32.mxu1 %vm135_vm2, %v128_v19  ;;  %v861_v16 = vshll.u32 %v1584_v15, %v858_v4 }
  0xcd   :  { %1455 = vmatmul.mubr.msk.f32.vlgmr.msra.gmra.mxu0 %vm135_vm2, %v130_v20  ;;  %1457 = vmatprep.subr.mxu1 %v1579_v1 }
  0xce   :  { %1469 = vmatpush3.msk.msra.mxu0 %vm139_vm3, %v499_v22  ;;  %1450 = vmatmul.mubr.msk.f32.gmra.mxu1 %vm135_vm2, %v129_v21 }
  0xcf   :  { %1473 = vmatprep.subr.msk.mxu0 %vm139_vm3, %v499_v22  ;;  %1470 = vmatprep.mubr.msk.f32.mxu0 %vm1580_vm0, %v1579_v1 }
  0xd0   :  { %1465 = vmatprep.mubr.msk.f32.mxu1 %vm1580_vm0, %v1579_v1 }
  0xd1   :  { %1471 = vmatmul.mubr.msk.f32.vlgmr.msra.gmra.mxu0 %vm135_vm2, %v125_v23 }
  0xd2   :  { %1474 = vmatpush3.msk.msra.mxu0 %vm139_vm3, %v499_v22  ;;  %1475 = vmatprep.mubr.msk.f32.mxu0 %vm135_vm2, %v126_v10  ;;  %v1583_v10 = vmov 920167782  }
  0xd3   :  { %1481 = vmatprep.subr.mxu0 %v1579_v1  ;;  %v871_v11 = vshrl.u32 %v1583_v10, %v859_v6 }
  0xd5   :  { %1476 = vmatmul.mubr.msk.f32.vlgmr.msra.gmra.mxu0 %vm135_vm2, %v127_v18  ;;  %v864_v18 = vshll.u32 %v1585_v17, %v858_v4 }
  0xd6   :  { %1482 = vmatpush3.msk.msra.mxu0 %vm139_vm3, %v499_v22  ;;  %1478 = vmatprep.mubr.msk.f32.mxu0 %vm135_vm2, %v128_v19  ;;  %v1586_v19 = vmov 2131351028   ;;  %v1587_v22 = vmov 1326507024   ;;  %vm846_vm3 = vcmp.lt.s32.totalorder %v1773_v56, 0 }
  0xd7   :  { %v874_v23 = vshrl.u32 %v1587_v22, %v859_v6 }
  0xd9   :  { %1479 = vmatmul.mubr.msk.f32.gmra.mxu0 %vm135_vm2, %v129_v21  ;;  %v873_v21 = vshll.u32 %v1583_v10, %v858_v4 }
  0xda   :  { %1483 = vmatprep.mubr.msk.f32.mxu0 %vm1580_vm0, %v1579_v1 }
  0xdd   :  { %1484 = vmatmul.mubr.msk.f32.vlgmr.msra.gmra.mxu0 %vm135_vm2, %v130_v20  ;;  %v867_v20 = vshll.u32 %v1586_v19, %v858_v4 }
 0x189   :  { %v209_v24 = vpop.f32.mrf.mxu0 }
 0x18a   :  { %v1448_v25 = vpop.f32.mrf.mxu1 }
 0x18b   :  { %v1443_v26 = vpop.f32.mrf.mxu0  ;;  %v317_v40 = vadd.f32 %v1448_v25, %v221_v38  ;;  %v865_v25 = vshrl.u32 %v1586_v19, %v859_v6 }
 0x18c   :  { %v311_v28 = vpop.f32.mrf.mxu1  ;;  %v868_v26 = vshrl.u32 %v1582_v8, %v859_v6 }
 0x18d   :  { %v1741_v29 = vpop.f32.mrf.mxu0  ;;  %v312_v44 = vadd.f32 %v311_v28, %v216_v43  ;;  %v851_v28 = vand.u32 8388607, %v844_v13 }
 0x18e   :  { %v1451_v30 = vpop.f32.mrf.mxu1 }
 0x18f   :  { %v327_v31 = vadd.f32 %v1451_v30, %v231_v27  ;;  %v1456_v32 = vpop.f32.mrf.mxu0  ;;  %v875_v30 = vor.u32 %v874_v23, %v873_v21  ;;  %v1054_v21 = vld [vmem:[%s1935_s7] sm:$0xff] }
 0x190   :  { %v321_v33 = vpop.f32.mrf.mxu1 }
 0x191   :  { %1458 = vmatpush3.xpose.msk.msra.mxu1 %vm412_vm4, %v327_v31  ;;  %v571_v34 = vpop.f32.mrf.mxu0  ;;  %v322_v36 = vadd.f32 %v321_v33, %v226_v35  ;;  %v960_v31 = vsel %vm959_vm6, %v958_v7, 0  ;;  %v866_v33 = vor.u32 %v865_v25, %v864_v18  ;;  %v1056_v7 = vld [vmem:[%s1935_s7 + $0x10] sm:$0xff]  ;;  %vm950_vm6 = vcmp.lt.s32.totalorder %v1776_v63, 0 }
 0x192   :  { %1459 = vmatprep.subr.mxu1 %v1579_v1  ;;  %v961_v57 = vshrl.u32 %v960_v31, 5 }
 0x193   :  { %v1472_v37 = vpop.f32.mrf.mxu0 }
 0x194   :  { %v962_v37 = vand.u32 31, %v960_v31  ;;  %vm983_vm11 = vcmp.lt.s32.totalorder %v961_v57, 4  ;;  %vm980_vm12 = vcmp.lt.s32.totalorder %v961_v57, 1  ;;  %vm982_vm13 = vcmp.lt.s32.totalorder %v961_v57, 3 }
 0x195   :  { %1460 = vmatpush3.xpose.msk.msra.mxu1 %vm412_vm4, %v322_v36  ;;  %v1477_v39 = vpop.f32.mrf.mxu0  ;;  %v852_v36 = vor.u32 8388608, %v851_v28  ;;  %vm981_vm15 = vcmp.lt.s32.totalorder %v961_v57, 2 }
 0x196   :  { %1461 = vmatprep.subr.mxu1 %v1579_v1  ;;  %v647_v50 = vadd.f32 %v1477_v39, %v221_v38  ;;  %v889_v38 = vsel %vm879_vm7, %v875_v30, 1326507024  ;;  %v974_v53 = vshll.u32 %v1582_v8, %v962_v37  ;;  %v977_v58 = vshll.u32 %v1583_v10, %v962_v37 }
 0x197   :  { %v641_v41 = vpop.f32.mrf.mxu0  ;;  %v965_v62 = vshll.u32 %v1584_v15, %v962_v37  ;;  %v968_v0 = vshll.u32 %v1585_v17, %v962_v37  ;;  %v971_v4 = vshll.u32 %v1586_v19, %v962_v37 }
 0x198   :  { %v642_v51 = vadd.f32 %v641_v41, %v216_v43  ;;  %v1057_v41 = vld [vmem:[%s1935_s7 + $0x18] sm:$0xff] }
 0x199   :  { %1462 = vmatpush3.xpose.msk.msra.mxu1 %vm412_vm4, %v317_v40  ;;  %v1480_v42 = vpop.f32.mrf.mxu0  ;;  %1497 = vmatprep.subr.mxu0 %v1057_v41 }
 0x19a   :  { %1463 = vmatprep.subr.mxu1 %v1579_v1  ;;  %v657_v47 = vadd.f32 %v1480_v42, %v231_v27  ;;  %v872_v27 = vor.u32 %v871_v11, %v870_v9  ;;  %1498 = vmatpush3.msra.mxu0 %v1057_v41  ;;  %v955_v9 = vand.u32 8388607, %v948_v55 }
 0x19b   :  { %v651_v45 = vpop.f32.mrf.mxu0  ;;  %1499 = vmatprep.subr.mxu0 %v1056_v7 }
 0x19c   :  { %v652_v49 = vadd.f32 %v651_v45, %v226_v35  ;;  %v885_v35 = vsel %vm879_vm7, %v872_v27, 920167782  ;;  %v890_v43 = vsel %vm878_vm9, %v872_v27, %v889_v38  ;;  %v963_v45 = vsub.s32 32, %v962_v37  ;;  %1500 = vmatpush3.msra.mxu0 %v1056_v7 }
 0x19d   :  { %1464 = vmatpush3.xpose.msk.msra.mxu1 %vm412_vm4, %v312_v44  ;;  %v1750_v46 = vpop.f32.mrf.mxu0  ;;  %v892_v44 = vshll.u32 %v852_v36, 8 }
 0x19e   :  { %1486 = vmatprep.subr.mxu1 %v1579_v1  ;;  %v975_v54 = vshrl.u32 %v1583_v10, %v963_v45  ;;  %v978_v59 = vshrl.u32 %v1587_v22, %v963_v45  ;;  %v966_v2 = vshrl.u32 %v1585_v17, %v963_v45  ;;  %v969_v3 = vshrl.u32 %v1586_v19, %v963_v45 }
 0x19f   :  { %v1485_v48 = vpop.f32.mrf.mxu0  ;;  %v972_v5 = vshrl.u32 %v1582_v8, %v963_v45  ;;  %v1055_v8 = vld [vmem:[%s1935_s7 + $0x8] sm:$0xff]  ;;  %v964_v38 = vshrl.u32 %v1584_v15, %v963_v45 }
 0x1a0   :  { %1466 = vmatmul.mubr.msk.f32.vlgmr.msra.gmra.mxu1 %vm412_vm4, %v209_v24  ;;  %v862_v24 = vshrl.u32 %v1585_v17, %v859_v6  ;;  %v860_v48 = vshrl.u32 %v1584_v15, %v859_v6  ;;  %v976_v6 = vor.u32 %v975_v54, %v974_v53  ;;  %v979_v10 = vor.u32 %v978_v59, %v977_v58 }
 0x1a1   :  { %1487 = vmatpush3.xpose.msk.msra.mxu1 %vm412_vm4, %v657_v47  ;;  %1494 = vmatprep.mubr.msk.f32.mxu1 %vm1580_vm0, %v1579_v1  ;;  %v967_v17 = vor.u32 %v966_v2, %v965_v62  ;;  %v970_v18 = vor.u32 %v969_v3, %v968_v0  ;;  %v973_v19 = vor.u32 %v972_v5, %v971_v4 }
 0x1a2   :  { %1488 = vmatprep.subr.mxu1 %v1579_v1  ;;  %v863_v32 = vor.u32 %v862_v24, %v861_v16  ;;  %1501 = vmatprep.subr.mxu0 %v1055_v8  ;;  %v956_v24 = vor.u32 8388608, %v955_v9  ;;  %v993_v25 = vsel %vm983_vm11, %v979_v10, 1326507024 }
 0x1a3   :  { %1502 = vmatpush3.msra.mxu0 %v1055_v8  ;;  %v992_v30 = vsel %vm980_vm12, %v970_v18, %v973_v19  ;;  %v994_v14 = vsel %vm982_vm13, %v976_v6, %v993_v25  ;;  %v985_v41 = vsel %vm983_vm11, %v973_v19, 2102212464 }
 0x1a4   :  { %v884_v39 = vsel %vm876_vm8, %v863_v32, %v866_v33  ;;  %v880_v11 = vsel %vm876_vm8, %v860_v48, %v863_v32  ;;  %1503 = vmatprep.subr.mxu0 %v1054_v21  ;;  %v996_v32 = vshll.u32 %v956_v24, 8 }
 0x1a5   :  { %1489 = vmatpush3.xpose.msk.msra.mxu1 %vm412_vm4, %v652_v49  ;;  %1504 = vmatpush3.msra.mxu0 %v1054_v21 }
 0x1a6   :  { %1490 = vmatprep.subr.mxu1 %v1579_v1 }
 0x1a9   :  { %1491 = vmatpush3.xpose.msk.msra.mxu1 %vm412_vm4, %v647_v50 }
 0x1aa   :  { %1492 = vmatprep.subr.mxu1 %v1579_v1 }
 0x1ad   :  { %1493 = vmatpush3.xpose.msk.msra.mxu1 %vm412_vm4, %v642_v51 }
 0x1ae   :  { %1519 = vmatprep.subr.mxu1 %v1579_v1 }
 0x1b0   :  { %1495 = vmatmul.mubr.msk.f32.vlgmr.msra.gmra.mxu1 %vm412_vm4, %v571_v34  ;;  %v869_v34 = vor.u32 %v868_v26, %v867_v20  ;;  %v989_v20 = vsel %vm983_vm11, %v976_v6, 920167782  ;;  %v988_v26 = vsel %vm980_vm12, %v967_v17, %v970_v18  ;;  %vm936_vm11 = vweird.f32 %v1773_v56 }
 0x1b1   :  { %1523 = vmatprep.mubr.msk.f32.mxu1 %vm1580_vm0, %v1579_v1  ;;  %v990_v27 = vsel %vm982_vm13, %v973_v19, %v989_v20 }
 0x1b2   :  { %v886_v40 = vsel %vm878_vm9, %v869_v34, %v885_v35  ;;  %v888_v42 = vsel %vm876_vm8, %v866_v33, %v869_v34  ;;  %v881_v49 = vsel %vm879_vm7, %v869_v34, 2102212464  ;;  %v995_v34 = vsel %vm981_vm15, %v992_v30, %v994_v14 }
 0x1b3   :  { %v887_v47 = vsel %vm877_vm10, %v884_v39, %v886_v40  ;;  %v891_v50 = vsel %vm877_vm10, %v888_v42, %v890_v43  ;;  %v882_v16 = vsel %vm878_vm9, %v866_v33, %v881_v49  ;;  %v991_v33 = vsel %vm981_vm15, %v988_v26, %v990_v27 }
 0x1b4   :  { %v1811_v51 = vmul.u32.u64.low %v892_v44, %v887_v47  ;;  %v1812_v52 = vmul.u32.u64.high %v892_v44, %v887_v47, %v1811_v51  ;;  %v1816_v60 = vmul.u32.u64.low %v892_v44, %v891_v50  ;;  %v1817_v61 = vmul.u32.u64.high %v892_v44, %v891_v50, %v1816_v60 }
 0x1b5   :  { %v883_v22 = vsel %vm877_vm10, %v880_v11, %v882_v16  ;;  %v1849_v36 = vmul.u32.u64.low %v996_v32, %v991_v33  ;;  %v1850_v37 = vmul.u32.u64.high %v996_v32, %v991_v33, %v1849_v36  ;;  %v984_v43 = vsel %vm980_vm12, %v964_v38, %v967_v17 }
 0x1b6   :  { %v902_v23 = vadd.s32 1, %v1812_v52  ;;  %vm901_vm14 = vc.u32 %v1817_v61, %v1811_v51  ;;  %v899_v28 = vmul.u32 %v892_v44, %v883_v22  ;;  %v986_v44 = vsel %vm982_vm13, %v970_v18, %v985_v41 }
 0x1b7   :  { %v1853_v39 = vmul.u32.u64.low %v996_v32, %v995_v34  ;;  %v1854_v40 = vmul.u32.u64.high %v996_v32, %v995_v34, %v1853_v39  ;;  %v987_v48 = vsel %vm981_vm15, %v984_v43, %v986_v44  ;;  %v1006_v49 = vadd.s32 1, %v1850_v37 }
 0x1b8   :  { %v903_v31 = vsel %vm901_vm14, %v902_v23, %v1812_v52  ;;  %v1003_v52 = vmul.u32 %v996_v32, %v987_v48  ;;  %v900_v9 = vadd.s32 %v1811_v51, %v1817_v61  ;;  %v408_v43 = vlaneseq }
 0x1b9   :  { %v904_v35 = vadd.s32 %v903_v31, %v899_v28  ;;  %vm1005_vm0 = vc.u32 %v1854_v40, %v1849_v36  ;;  %v1004_v26 = vadd.s32 %v1849_v36, %v1854_v40  ;;  %vm1878_vm7 = vcmp.le.f32.partialorder %v948_v55, 0.7853982 }
 0x1ba   :  { %v1007_v15 = vsel %vm1005_vm0, %v1006_v49, %v1850_v37  ;;  %vm1040_vm15 = vweird.f32 %v1776_v63  ;;  %vm1321_vm0 = vcmask 122880  }
 0x1bb   :  { %v905_v42 = vadd.s32 536870912, %v904_v35  ;;  %v1008_v53 = vadd.s32 %v1007_v15, %v1003_v52  ;;  %v333_v15 = vpop.permute.xlu0 %332 }
 0x1bc   :  { %v405_v55 = vadd.f32 %v1741_v29, %v333_v15 }
 0x1bd   :  { %v906_v47 = vshrl.u32 %v905_v42, 30  ;;  %v1009_v58 = vadd.s32 536870912, %v1008_v53 }
 0x1bf   :  { %v907_v50 = vshll.u32 %v906_v47, 30  ;;  %v1863_v60 = vshrl.u32 %v1009_v58, 30  ;;  %v930_v38 = vsub.s32 4, %v906_v47 }
 0x1c1   :  { %v908_v45 = vsub.s32 %v904_v35, %v907_v50  ;;  %v1011_v0 = vshll.u32 %v1863_v60, 30  ;;  %v931_v39 = vsel %vm846_vm3, %v930_v38, %v906_v47  ;;  %v409_v50 = vshrl.u32 %v408_v43, 7 }
 0x1c2   :  { %v933_v41 = vsel %vm845_vm5, 0, %v931_v39 }
 0x1c3   :  { %v910_v54 = vsub.s32 0, %v908_v45  ;;  %v1012_v2 = vsub.s32 %v1008_v53, %v1011_v0  ;;  %v937_v44 = vadd.s32 3, %v933_v41  ;;  %v410_v58 = vsub.s32 0, %v409_v50 }
 0x1c5   :  { %v1370_v59 = vmin.u32 %v910_v54, %v908_v45  ;;  %v1014_v3 = vsub.s32 0, %v1012_v2  ;;  %v938_v52 = vand.u32 3, %v937_v44 }
 0x1c7   :  { %v912_v62 = vclz %v1370_v59  ;;  %v1374_v5 = vmin.u32 %v1014_v3, %v1012_v2  ;;  %vm940_vm8 = vcmp.eq.s32.totalorder %v938_v52, 0  ;;  %vm943_vm9 = vcmp.eq.s32.totalorder %v938_v52, 2 }
 0x1c8   :  { %vm939_vm10 = vcmp.lt.s32.totalorder %v938_v52, 2 }
 0x1c9   :  { %v1371_v57 = vadd.s32 4294967294, %v912_v62  ;;  %v1016_v7 = vclz %v1374_v5 }
 0x1cb   :  { %vm1372_vm1 = vcmp.lt.s32.totalorder %v1371_v57, 0  ;;  %v1375_v16 = vadd.s32 4294967294, %v1016_v7 }
 0x1cc   :  { %v915_v4 = vsel %vm1372_vm1, 0, %v1371_v57  ;;  %v411_v57 = vrot.slane %v405_v55, %v410_v58 }
 0x1cd   :  { %v920_v6 = vsub.s32 4294967266, %v915_v4  ;;  %v916_v10 = vsub.s32 32, %v915_v4  ;;  %v917_v8 = vshll.u32 %v908_v45, %v915_v4  ;;  %vm1376_vm2 = vcmp.lt.s32.totalorder %v1375_v16, 0 }
 0x1ce   :  { %v1019_v21 = vsel %vm1376_vm2, 0, %v1375_v16  ;;  %v1034_v45 = vsub.s32 4, %v1863_v60 }
 0x1cf   :  { %v921_v11 = vadd.s32 127, %v920_v6  ;;  %v918_v17 = vshrl.u32 %v900_v9, %v916_v10  ;;  %v1024_v24 = vsub.s32 4294967266, %v1019_v21  ;;  %v1020_v27 = vsub.s32 32, %v1019_v21 }
 0x1d0   :  { %v1021_v51 = vshll.u32 %v1012_v2, %v1019_v21  ;;  %v1035_v59 = vsel %vm950_vm6, %v1034_v45, %v1863_v60 }
 0x1d1   :  { %v922_v18 = vshll.u32 %v921_v11, 23  ;;  %v919_v19 = vor.u32 %v918_v17, %v917_v8  ;;  %v1025_v28 = vadd.s32 127, %v1024_v24  ;;  %v1022_v61 = vshrl.u32 %v1004_v26, %v1020_v27 }
 0x1d2   :  { %v1037_v3 = vsel %vm1878_vm7, 0, %v1035_v59 }
 0x1d3   :  { %v923_v20 = vor.u32 4788187, %v922_v18  ;;  %v926_v23 = vcvt.s32.f32 %v919_v19  ;;  %v1026_v14 = vshll.u32 %v1025_v28, 23  ;;  %v1023_v32 = vor.u32 %v1022_v61, %v1021_v51  ;;  %v1147_v28 = vld [vmem:[%s1936_s8 + $0x10] sm:$0xff]  ;;  %v1377_v51 = vld [vmem:[%s1937_s9 + $0x1] ss:$0 sm:$0xff] }
 0x1d4   :  { %v1041_v7 = vadd.s32 3, %v1037_v3  ;;  %v727_v18 = vadd.f32 %v1750_v46, %v333_v15  ;;  %v1148_v46 = vld [vmem:[%s1936_s8 + $0x18] sm:$0xff] }
 0x1d5   :  { %v924_v22 = vand.u32 2147483647, %v923_v20  ;;  %v1027_v33 = vor.u32 4788187, %v1026_v14  ;;  %v1030_v37 = vcvt.s32.f32 %v1023_v32  ;;  %1508 = vmatprep.subr.mxu0 %v1148_v46 }
 0x1d6   :  { %v1042_v60 = vand.u32 3, %v1041_v7  ;;  %v733_v20 = vrot.slane %v727_v18, %v410_v58 }
 0x1d7   :  { %v927_v25 = vmul.f32 %v926_v23, %v924_v22  ;;  %v1028_v35 = vand.u32 2147483647, %v1027_v33 }
 0x1d8   :  { %vm1044_vm12 = vcmp.eq.s32.totalorder %v1042_v60, 0  ;;  %vm1047_vm13 = vcmp.eq.s32.totalorder %v1042_v60, 2  ;;  %vm1043_vm14 = vcmp.lt.s32.totalorder %v1042_v60, 2 }
 0x1d9   :  { %v928_v30 = vxor.u32 2147483648, %v927_v25  ;;  %v1031_v36 = vmul.f32 %v1030_v37, %v1028_v35  ;;  %v1588_v35 = vmov 1   ;;  %v1380_v37 = vld [vmem:[%s1937_s9 + $0x2] ss:$0 sm:$0xff] }
 0x1da   :  { %1547 = vset.pattern.permute.xlu1 %v1588_v35  ;;  %1548 = vset.pattern.permute.xlu0 %v1588_v35 }
 0x1db   :  { %v929_v31 = vsel %vm846_vm3, %v928_v30, %v927_v25  ;;  %v1032_v40 = vxor.u32 2147483648, %v1031_v36  ;;  %v1145_v30 = vld [vmem:[%s1936_s8] sm:$0xff]  ;;  %1239 = vperm.xlu1 %1547, %v1686_v12  }
 0x1dc   :  { %v932_v34 = vsel %vm845_vm5, %v1773_v56, %v929_v31  ;;  %v41_v12 = vld [vmem:[%s1937_s9 + $0x5] sm:$0x1] }
 0x1dd   :  { %1549 = vcosq.f32 %v932_v34  ;;  %v1033_v42 = vsel %vm950_vm6, %v1032_v40, %v1031_v36 }
 0x1de   :  { %1551 = vsinq.f32 %v932_v34  ;;  %v1036_v47 = vsel %vm1878_vm7, %v1776_v63, %v1033_v42  ;;  %v1146_v63 = vld [vmem:[%s1936_s8 + $0x8] sm:$0xff] }
 0x1df   :  { %1553 = vcosq.f32 %v1036_v47 }
 0x1e0   :  { %1555 = vsinq.f32 %v1036_v47 }
 0x1ea   :  { %v1550_v48 = vpop.eup %1549 }
 0x1eb   :  { %v1552_v49 = vpop.eup %1551  ;;  %v944_v54 = vxor.u32 2147483648, %v1550_v48 }
 0x1ec   :  { %v941_v53 = vxor.u32 2147483648, %v1552_v49  ;;  %v1554_v11 = vpop.eup %1553 }
 0x1ed   :  { %v945_v0 = vsel %vm943_vm9, %v944_v54, %v1552_v49  ;;  %v1556_v16 = vpop.eup %1555  ;;  %v1048_v17 = vxor.u32 2147483648, %v1554_v11 }
 0x1ee   :  { %v942_v62 = vsel %vm940_vm8, %v1550_v48, %v941_v53  ;;  %v1045_v8 = vxor.u32 2147483648, %v1556_v16 }
 0x1ef   :  { %v946_v5 = vsel %vm939_vm10, %v942_v62, %v945_v0  ;;  %v1049_v56 = vsel %vm1047_vm13, %v1048_v17, %v1556_v16 }
 0x1f0   :  { %v947_v9 = vsel %vm936_vm11, nan, %v946_v5  ;;  %v1046_v19 = vsel %vm1044_vm12, %v1554_v11, %v1045_v8 }
 0x1f1   :  { %v1050_v23 = vsel %vm1043_vm14, %v1046_v19, %v1049_v56 }
 0x1f2   :  { %v1051_v26 = vsel %vm1040_vm15, nan, %v1050_v23 }
 0x256   :  { %v1240_v13 = vpop.permute.xlu1 %1239 }
 0x260   :  { %v494_v2 = vpop.f32.mrf.mxu1 }
 0x261   :  { %v495_v4 = vadd.f32 %v494_v2, %v411_v57 }
 0x262   :  { %v1467_v29 = vpop.f32.mrf.mxu1 }
 0x263   :  { %v498_v6 = vmax.f32 %v495_v4, 0.0 }
 0x265   :  { %v1052_v10 = vadd.f32 %v947_v9, %v498_v6 }
 0x267   :  { %1505 = vmatprep.mubr.msk.f32.mxu0 %vm412_vm4, %v1052_v10  ;;  %v1234_v43 = vmul.f32 2.0, %v1052_v10 }
 0x270   :  { %v815_v21 = vpop.f32.mrf.mxu1 }
 0x271   :  { %v816_v22 = vadd.f32 %v815_v21, %v733_v20 }
 0x272   :  { %v1496_v24 = vpop.f32.mrf.mxu1 }
 0x273   :  { %v819_v25 = vmax.f32 %v816_v22, 0.0 }
 0x275   :  { %v1053_v27 = vadd.f32 %v1051_v26, %v819_v25 }
 0x277   :  { %1506 = vmatmul.mubr.msk.f32.vlgmr.msra.gmra.mxu0 %vm412_vm4, %v1053_v27  ;;  %v1235_v39 = vmul.f32 2.0, %v1053_v27 }
 0x278   :  { %1509 = vmatpush3.msra.mxu0 %v1148_v46 }
 0x279   :  { %1510 = vmatprep.subr.mxu0 %v1147_v28 }
 0x27a   :  { %1511 = vmatpush3.msra.mxu0 %v1147_v28 }
 0x27b   :  { %1512 = vmatprep.subr.mxu0 %v1146_v63 }
 0x27c   :  { %1513 = vmatpush3.msra.mxu0 %v1146_v63 }
 0x27d   :  { %1514 = vmatprep.subr.mxu0 %v1145_v30 }
 0x27e   :  { %1515 = vmatpush3.msra.mxu0 %v1145_v30 }
 0x337   :  { %v1507_v61 = vpop.f32.mrf.mxu0 }
 0x338   :  { %v1140_v14 = vadd.f32 %v1507_v61, %v1377_v51 }
 0x339   :  { %v1134_v31 = vpop.f32.mrf.mxu0 }
 0x33a   :  { %v1135_v32 = vadd.f32 %v1377_v51, %v1134_v31  ;;  %v1144_v34 = vmax.f32 %v1140_v14, 0.0 }
 0x33c   :  { %v1143_v33 = vmax.f32 %v1135_v32, 0.0 }
 0x33e   :  { %1516 = vmatprep.mubr.msk.f32.mxu0 %vm412_vm4, %v1143_v33 }
 0x33f   :  { %1517 = vmatmul.mubr.msk.f32.vlgmr.msra.gmra.mxu0 %vm412_vm4, %v1144_v34 }
 0x3ff   :  { %v1518_v38 = vpop.f32.mrf.mxu0 }
 0x400   :  { %v1231_v36 = vadd.f32 %v1518_v38, %v1380_v37 }
 0x401   :  { %v1225_v40 = vpop.f32.mrf.mxu0 }
 0x402   :  { %v1237_v41 = vadd.f32 %v1235_v39, %v1231_v36  ;;  %v1226_v42 = vadd.f32 %v1380_v37, %v1225_v40 }
 0x404   :  { %1520 = vmatpush3.xpose.msk.msra.mxu1 %vm412_vm4, %v1237_v41  ;;  %v1236_v44 = vadd.f32 %v1234_v43, %v1226_v42 }
 0x405   :  { %1521 = vmatprep.subr.mxu1 %v1579_v1 }
 0x408   :  { %1522 = vmatpush3.xpose.msk.msra.mxu1 %vm412_vm4, %v1236_v44 }
 0x40b   :  { %1524 = vmatmul.mubr.msk.f32.vlgmr.msra.gmra.mxu1 %vm412_vm4, %v41_v12 }
 0x4cb   :  { %v1317_v48 = vpop.f32.mrf.mxu1 }
 0x4cc   :  { %v1318_v47 = vadd.f32 %v1317_v48, %v1240_v13 }
 0x4cd   :  { %v1525_v49 = vpop.f32.mrf.mxu1 }
 0x4ce   :  { %1322 = vst.msk [vmem:[#allocation2] sm:$0x1] %vm1321_vm0, %v1318_v47 }
 0x4cf   :  { %1568 = shalt.err (!%p1565_p4)
}
 0x4d0   :  { %1332 = dma.vmem_to_hbm [thread:$0]  %s1330_s5, 16, %s1938_s10, [#allocation3]  }
 0x4d1   :  { %1577 = dma.done.wait [#allocation3], 16  }
 0x4d2   :  { %1578 = vsyncadd [#allocation3], 4294967280 }
 0x4d3   :  { %1336 = vsyncpa [#allocation3], 1 }

</bundles_post_ra>
